<compile_context>
chip_gen: v6e
topology: v6e:2x2x1
jax: 0.10.0
libtpu: 0.0.40
codegen_flags: <defaults>
</compile_context>

<pallas_src>
import functools
import numpy as np

import jax
import jax.numpy as jnp
from jax.experimental import pallas as pl
from jax.experimental.pallas import tpu as pltpu


LANE = 128          # TPU vreg lane width: keep the batch axis lane-dense
MAX_TILE = 2048     # lanes per grid step; tiny vs VMEM on v5e/v6e/v7x


# -------------------------- Pallas kernel --------------------------

def _edgebank_kernel(time_window, bank_ref, t_ref, out_ref):
    # bank_ref: [2, TE]  last-seen time for (pos, neg) query edges (-1 = unseen)
    # t_ref:    [1, TE]  batch timestamps
    # out_ref:  [2, TE]  0/1 predictions (row 0 = pos, row 1 = neg)
    prev_t = jnp.maximum(t_ref[...] - time_window, 0.0)        # VPU, broadcast [1,TE]
    out_ref[...] = (bank_ref[...] >= prev_t).astype(jnp.float32)


def _choose_tile(num_edges):
    e_pad = pl.cdiv(num_edges, LANE) * LANE
    if e_pad <= LANE:
        return LANE
    # aim for >= 2 grid steps (v7x has 2 TensorCores) while keeping tiles large
    # enough that the ~0.35us per-grid-step overhead is amortized.
    tile = min(pl.cdiv(e_pad, 2 * LANE) * LANE, MAX_TILE)
    return max(tile, LANE)


def edgebank_predict_pallas(bank_t_pair, t, time_window):
    """bank_t_pair: [2, E] f32 last-seen times for (pos, neg) queries; t: [E] f32."""
    E = t.shape[0]
    tile_e = _choose_tile(E)
    e_pad = pl.cdiv(E, tile_e) * tile_e
    grid = (e_pad // tile_e,)

    # pad the lane axis; padded lanes produce 0 and are sliced away below.
    bank_p = jnp.pad(bank_t_pair, ((0, 0), (0, e_pad - E)), constant_values=-1.0)
    t_p = jnp.pad(t, (0, e_pad - E))[None, :]

    out = pl.pallas_call(
        # time_window is a constructor-time constant of the model, so baking it
        # in via partial does not cause retraces across batches.
        functools.partial(_edgebank_kernel, float(time_window)),
        grid=grid,
        in_specs=[pl.BlockSpec((2, tile_e), lambda i: (0, i)),
                  pl.BlockSpec((1, tile_e), lambda i: (0, i))],
        out_specs=pl.BlockSpec((2, tile_e), lambda i: (0, i)),
        out_shape=jax.ShapeDtypeStruct((2, e_pad), jnp.float32),
        compiler_params=pltpu.CompilerParams(dimension_semantics=("parallel",)),
    )(bank_p, t_p)
    return out[:, :E]


# -------------------------- EdgeBank forward (glue + kernel) --------------------------

def edgebank_forward(bank, src, pos_dst, neg_dst, t, time_window):
    # dict lookup -> dense-table gather of E scalars per query (plain JAX glue).
    bank_pos = bank[src, pos_dst]
    bank_neg = bank[src, neg_dst]
    packed = jnp.stack([bank_pos, bank_neg], axis=0)           # [2, E]

    out = edgebank_predict_pallas(packed, t.astype(jnp.float32), time_window)

    pos_out = out[0][:, None]                                  # [E, 1] like unsqueeze(1)
    neg_out = out[1][:, None]
    emb_src, emb_pos_dst = None, None                          # EdgeBank has no embeddings
    return pos_out, neg_out, emb_src, emb_pos_dst


def edgebank_update(bank, src, dst, t):
    # State mutation (EdgeBank.update), not part of the forward pass: the dict
    # assignment edgebank[(s,d)] = t becomes a vectorized scatter. With
    # monotonically increasing event times, .max() matches "last write wins".
    return bank.at[src, dst].max(t.astype(bank.dtype))


# -------------------------- pure-JAX reference --------------------------

def edgebank_ref(bank, src, pos_dst, neg_dst, t, time_window):
    t = t.astype(jnp.float32)
    prev_t = jnp.maximum(t - time_window, 0.0)
    pos = (bank[src, pos_dst] >= prev_t).astype(jnp.float32)[:, None]
    neg = (bank[src, neg_dst] >= prev_t).astype(jnp.float32)[:, None]
    return pos, neg, None, None


if __name__ == "__main__":
    key = jax.random.PRNGKey(0)

    num_nodes = 64
    E = 16                       # query edges in the batch
    timespan = 100.0
    time_window = 0.1 * timespan  # finite window (torch default np.inf => prev_t clamps to 0)

    ks = jax.random.split(key, 6)

    # historical interactions that populate the edge bank (via update())
    hist_E = 128
    h_src = jax.random.randint(ks[0], (hist_E,), 0, num_nodes)
    h_dst = jax.random.randint(ks[1], (hist_E,), 0, num_nodes)
    h_t = jax.random.uniform(ks[2], (hist_E,), jnp.float32, 0.0, 20.0)

    bank = jnp.full((num_nodes, num_nodes), -1.0, jnp.float32)   # -1 = never seen
    bank = edgebank_update(bank, h_src, h_dst, h_t)

    # query batch: half the positives are known historical edges, half are fresh
    src = jnp.concatenate([h_src[: E // 2],
                           jax.random.randint(ks[3], (E - E // 2,), 0, num_nodes)])
    pos_dst = jnp.concatenate([h_dst[: E // 2],
                               jax.random.randint(ks[4], (E - E // 2,), 0, num_nodes)])
    neg_dst = jax.random.randint(ks[5], (E,), 0, num_nodes)
    t_batch = jnp.linspace(15.0, 30.0, E, dtype=jnp.float32)

    pos_out, neg_out, emb_src, emb_dst = edgebank_forward(
        bank, src, pos_dst, neg_dst, t_batch, time_window)
    jax.block_until_ready((pos_out, neg_out))

    # verify against pure-JAX reference (outputs are exact 0/1 values)
    r_pos, r_neg, _, _ = edgebank_ref(bank, src, pos_dst, neg_dst, t_batch, time_window)
    np.testing.assert_allclose(np.asarray(pos_out), np.asarray(r_pos), rtol=0, atol=0)
    np.testing.assert_allclose(np.asarray(neg_out), np.asarray(r_neg), rtol=0, atol=0)
    assert pos_out.shape == (E, 1) and neg_out.shape == (E, 1)
    assert emb_src is None and emb_dst is None

    print("KERNEL_OK")
</pallas_src>

<mosaic_0001>
module attributes {stable_mosaic.version = 11 : i64} {
  func.func @_edgebank_kernel(%arg0: i32, %arg1: memref<2x128xf32, #tpu.memory_space<vmem>>, %arg2: memref<1x128xf32, #tpu.memory_space<vmem>>, %arg3: memref<2x128xf32, #tpu.memory_space<vmem>>) attributes {dimension_semantics = [#tpu.dimension_semantics<parallel>], iteration_bounds = array<i64: 1>, scalar_prefetch = 0 : i64, scratch_operands = 0 : i64, tpu.core_type = #tpu.core_type<tc>, window_params = [{transform_indices = @transform_0, window_bounds = array<i64: 2, 128>}, {transform_indices = @transform_1, window_bounds = array<i64: 1, 128>}, {transform_indices = @transform_2, window_bounds = array<i64: 2, 128>}]} {
    %c0 = arith.constant 0 : index
    %c0_0 = arith.constant 0 : index
    %0 = vector.load %arg2[%c0, %c0_0] : memref<1x128xf32, #tpu.memory_space<vmem>>, vector<1x128xf32>
    %cst = arith.constant 1.000000e+01 : f32
    %1 = vector.broadcast %cst : f32 to vector<1x128xf32>
    %2 = arith.subf %0, %1 : vector<1x128xf32>
    %cst_1 = arith.constant 0.000000e+00 : f32
    %3 = vector.broadcast %cst_1 : f32 to vector<1x128xf32>
    %4 = arith.maximumf %2, %3 : vector<1x128xf32>
    %c0_2 = arith.constant 0 : index
    %c0_3 = arith.constant 0 : index
    %5 = vector.load %arg1[%c0_2, %c0_3] : memref<2x128xf32, #tpu.memory_space<vmem>>, vector<2x128xf32>
    %6 = vector.broadcast %4 : vector<1x128xf32> to vector<2x128xf32>
    %7 = arith.cmpf oge, %5, %6 : vector<2x128xf32>
    %8 = arith.extui %7 : vector<2x128xi1> to vector<2x128xi32>
    %9 = arith.sitofp %8 : vector<2x128xi32> to vector<2x128xf32>
    %c0_4 = arith.constant 0 : index
    %c0_5 = arith.constant 0 : index
    %10 = vector.load %arg3[%c0_4, %c0_5] : memref<2x128xf32, #tpu.memory_space<vmem>>, vector<2x128xf32>
    tpu.vector_store %arg3[%c0_4, %c0_5], %9 {strides = array<i32>} : memref<2x128xf32, #tpu.memory_space<vmem>>, vector<2x128xf32>,
    return
  }
  func.func @transform_0(%arg0: i32) -> (i32, i32) {
    %c0_i32 = arith.constant 0 : i32
    %c0_i32_0 = arith.constant 0 : i32
    return %c0_i32, %arg0 : i32, i32
  }
  func.func @transform_1(%arg0: i32) -> (i32, i32) {
    %c0_i32 = arith.constant 0 : i32
    %c0_i32_0 = arith.constant 0 : i32
    return %c0_i32, %arg0 : i32, i32
  }
  func.func @transform_2(%arg0: i32) -> (i32, i32) {
    %c0_i32 = arith.constant 0 : i32
    %c0_i32_0 = arith.constant 0 : i32
    return %c0_i32, %arg0 : i32, i32
  }
}

</mosaic_0001>

<bundles_post_ra>
// kernel: tpu_custom_call.1
= control target key start
LH: loop header
LB: loop body
LE: loop exit
PB: predicated region body
PF: predicated region fallthrough
CT: control target
= control target key end

     0   :  { %7 = vsyncpa [#allocation3], 0  ;;  %s129_s0 = inlined_call_operand.hbm [shape: f32[2,128], index: 0, kind: input, shape index: {}]   ;;  %s130_s1 = inlined_call_operand.vmem [shape: f32[1,128], index: 1, kind: input, shape index: {}]   ;;  %s131_s2 = inlined_call_operand.hbm [shape: f32[2,128], index: 2, kind: output, shape index: {}]  }
   0x1   :  { %8 = vsyncpa [#allocation4], 0  ;;  %s102_s9 = smov [#allocation2]  }
   0x2   :  { %s15_s10 = sshll.u32 %s102_s9, 4  ;;  %s16_s10 = int_to_ptr.vmem [resolvable:$true] %s15_s10 }
   0x3   :  { %s66_s11 = scalar_lea.vmem %s16_s10, 32  ;;  %p71_p1 = scmp.lt.s32.totalorder %s16_s10, %s16_s10 }
   0x4   :  { %p67_p0 = scmp.ne.s32.totalorder %s16_s10, %s66_s11  ;;  %p72_p2 = scmp.lt.s32.totalorder %s66_s11, %s66_s11 }
   0x6   :  { %p73_p3 = por %p72_p2, %p71_p1 }
   0x8   :  { %p74_p4 = pnand %p73_p3, %p67_p0 }
   0xa   :  { %77 = shalt.err (!%p74_p4)
}
   0xb   :  { %18 = dma.hbm_to_vmem [thread:$0]  %s129_s0, 32, %s16_s10, [#allocation3]  }
   0xc   :  { %98 = dma.done.wait [#allocation3], 32  }
   0xd   :  { %99 = vsyncadd [#allocation3], 4294967264  ;;  %v29_v0 = vlaneseq  ;;  %v24_v2 = vld [vmem:[%s130_s1] sm:$0x1]  ;;  %s103_s16 = smov [#allocation5]   ;;  %v104_v8 = vmov 0.0  }
   0xe   :  { %v53_v3 = vadd.f32 -10.0, %v24_v2  ;;  %v27_v6 = vld [vmem:[#allocation2] sm:$0x3]  ;;  %s44_s17 = sshll.u32 %s103_s16, 4  ;;  %s45_s17 = int_to_ptr.vmem [resolvable:$true] %s44_s17 }
   0xf   :  { %v30_v1 = vshrl.u32 %v29_v0, 7  ;;  %s78_s0 = scalar_lea.vmem %s45_s17, 32  ;;  %p83_p6 = scmp.lt.s32.totalorder %s45_s17, %s45_s17 }
  0x10   :  { %v26_v5 = vmax.f32 %v53_v3, 0.0  ;;  %p79_p5 = scmp.ne.s32.totalorder %s45_s17, %s78_s0  ;;  %p84_p7 = scmp.lt.s32.totalorder %s78_s0, %s78_s0 }
  0x11   :  { %v31_v4 = vsub.s32 0, %v30_v1 }
  0x12   :  { %p85_p8 = por %p84_p7, %p83_p6 }
  0x13   :  { %v32_v7 = vrot.slane %v26_v5, %v31_v4 }
  0x14   :  { %p86_p9 = pnand %p85_p8, %p79_p5 }
  0x15   :  { %vm34_vm0 = vcmp.ge.f32.partialorder %v27_v6, %v32_v7 }
  0x16   :  { %v54_v9 = vsel %vm34_vm0, 1.0, %v104_v8 }
  0x17   :  { %37 = vst [vmem:[#allocation5] sm:$0x3] %v54_v9 }
  0x18   :  { %89 = shalt.err (!%p86_p9)
}
  0x19   :  { %47 = dma.vmem_to_hbm [thread:$0]  %s45_s17, 32, %s131_s2, [#allocation4]  }
  0x1a   :  { %100 = dma.done.wait [#allocation4], 32  }
  0x1b   :  { %101 = vsyncadd [#allocation4], 4294967264 }
  0x1c   :  { %51 = vsyncpa [#allocation3], 1 }
  0x1d   :  { %52 = vsyncpa [#allocation4], 1 }

</bundles_post_ra>
